<compile_context>
chip_gen: v7x
topology: tpu7x:2x2x1
jax: 0.10.0
libtpu: 0.0.40
codegen_flags: <defaults>
</compile_context>

<pallas_src>
import math
from functools import partial

import numpy as np
import jax
import jax.numpy as jnp
from jax import lax
from jax.experimental import pallas as pl
from jax.experimental.pallas import tpu as pltpu


# ----------------------------------------------------------------------------- #
# Hardware / tiling helpers
# ----------------------------------------------------------------------------- #
def _vmem_capacity_bytes():
    try:
        return int(pltpu.get_tpu_info().vmem_capacity_bytes)
    except Exception:
        return 64 * 1024 * 1024            # conservative: v7x per-core VMEM


def _pick_tile(dim, target, align):
    """Largest multiple of `align` that divides `dim` and is <= target (else full dim)."""
    if dim <= target:
        return dim
    t = (target // align) * align
    while t >= align:
        if dim % t == 0:
            return t
        t -= align
    return dim


# ----------------------------------------------------------------------------- #
# Fused  (linear -> norm -> [relu] -> [+residual])  kernel
# ----------------------------------------------------------------------------- #
def _make_fused_kernel(*, n_k, tk, norm, apply_relu, add_residual, eps,
                       x_full_k, use_scratch_acc):
    def kernel(*refs):
        if add_residual:
            x_ref, w_ref, p_ref, res_ref, o_ref, *scratch = refs
        else:
            x_ref, w_ref, p_ref, o_ref, *scratch = refs
            res_ref = None
        # Accumulate directly into the resident output block when it is f32;
        # otherwise (bf16 output) use the dedicated f32 VMEM accumulator.
        acc_ref = scratch[0] if use_scratch_acc else o_ref

        k = pl.program_id(2)

        @pl.when(k == 0)
        def _():
            # Fold the bias into the accumulator init: no epilogue bias add.
            bias = p_ref[0:1, :].astype(jnp.float32)
            acc_ref[...] = jnp.broadcast_to(bias, acc_ref.shape)

        if x_full_k and n_k > 1:
            # Full-K activation slab is resident; slice the current K chunk.
            start = pl.multiple_of(k * tk, tk)
            xk = x_ref[:, pl.ds(start, tk)]
        else:
            xk = x_ref[...]

        acc_ref[...] += jnp.dot(xk.astype(jnp.bfloat16),
                                w_ref[...].astype(jnp.bfloat16),
                                preferred_element_type=jnp.float32)

        @pl.when(k == n_k - 1)
        def _():
            z = acc_ref[...]
            scale = p_ref[1:2, :].astype(jnp.float32)
            shift = p_ref[2:3, :].astype(jnp.float32)
            if norm == "batchnorm":
                # eval-mode BatchNorm1d == per-feature affine (scale/shift prefolded)
                y = z * scale + shift
            else:
                # LayerNorm over the feature axis (block spans the full row, tn == N)
                mean = jnp.mean(z, axis=-1, keepdims=True)
                zc = z - mean
                var = jnp.mean(zc * zc, axis=-1, keepdims=True)
                y = zc * lax.rsqrt(var + eps) * scale + shift
            if apply_relu:
                y = jnp.maximum(y, 0.0)
            if add_residual:
                y = y + res_ref[...].astype(jnp.float32)
            o_ref[...] = y.astype(o_ref.dtype)

    return kernel


def fused_linear_norm(x, w, p, *, norm, apply_relu=False, residual=None,
                      eps=1e-5, out_dtype=None, tm=None, tn=None, tk=None):
    """y = [residual +] [relu]( norm( x @ W + b ) ), fully fused in one pallas_call.

    x: (B, K) activations; w: (K, N) weight (stored transposed, ideally bf16);
    p: (3, N) f32 stacked [bias, scale, shift]; residual: optional (B, N) f32.
    """
    B, K = x.shape
    Kw, N = w.shape
    assert K == Kw and p.shape == (3, N)
    out_dtype = out_dtype if out_dtype is not None else x.dtype

    capacity = _vmem_capacity_bytes()
    big_vmem = capacity >= (96 << 20)            # v5e / v6e (128 MiB physical)

    # Tile sizes: M tiled so VMEM no longer scales with B; N/K tiles 128-aligned
    # for the MXU and for unmasked lane-dense stores.
    if tm is None:
        tm = _pick_tile(B, 256, 8)
    if tk is None:
        tk = _pick_tile(K, 1024 if big_vmem else 512, 128)
    if tn is None:
        tn = _pick_tile(N, 1024 if big_vmem else 512, 128)
    if norm == "layernorm":
        tn = N                                    # LN epilogue needs the full row
    n_m, n_j, n_k = B // tm, N // tn, K // tk

    x_bytes = x.dtype.itemsize
    w_bytes = w.dtype.itemsize
    o_bytes = np.dtype(out_dtype).itemsize
    r_bytes = residual.dtype.itemsize if residual is not None else 0

    # Keep the per-M-tile activation slab resident across the whole (j, k) sweep
    # when small: x is then DMA'd from HBM once instead of n_j times.
    x_full_k = (n_k == 1) or (2 * tm * K * x_bytes <= 8 * 1024 * 1024)
    # Separate f32 accumulator only needed when the output dtype is not f32.
    use_scratch_acc = np.dtype(out_dtype) != np.dtype(jnp.float32)

    if x_full_k:
        x_spec = pl.BlockSpec((tm, K), lambda m, j, k: (m, 0))
    else:
        x_spec = pl.BlockSpec((tm, tk), lambda m, j, k: (m, k))

    in_specs = [
        x_spec,
        pl.BlockSpec((tk, tn), lambda m, j, k: (k, j)),   # weight tile (streamed)
        pl.BlockSpec((3, tn), lambda m, j, k: (0, j)),    # [bias, scale, shift]
    ]
    args = [x, w, p]
    if residual is not None:
        in_specs.append(pl.BlockSpec((tm, tn), lambda m, j, k: (m, j)))
        args.append(residual)

    scratch_shapes = [pltpu.VMEM((tm, tn), jnp.float32)] if use_scratch_acc else []

    kernel = _make_fused_kernel(n_k=n_k, tk=tk, norm=norm, apply_relu=apply_relu,
                                add_residual=residual is not None, eps=eps,
                                x_full_k=x_full_k, use_scratch_acc=use_scratch_acc)

    # VMEM budget: double-buffered blocks (+ accumulator), headroom, capped below
    # the physical per-core capacity (64 MiB v7x / 128 MiB v5e,v6e).
    est = 2 * (tm * (K if x_full_k else tk) * x_bytes
               + tk * tn * w_bytes
               + 3 * tn * 4
               + tm * tn * o_bytes
               + tm * tn * r_bytes)
    if use_scratch_acc:
        est += tm * tn * 4
    vmem_limit = int(min(capacity * 0.9, max(2 * est, 32 * 1024 * 1024)))

    cost = pl.CostEstimate(
        flops=2 * B * K * N,
        transcendentals=B if norm == "layernorm" else 0,
        bytes_accessed=(B * K * x_bytes + K * N * w_bytes + 3 * N * 4
                        + B * N * o_bytes + B * N * r_bytes),
    )

    return pl.pallas_call(
        kernel,
        out_shape=jax.ShapeDtypeStruct((B, N), out_dtype),
        grid_spec=pltpu.PrefetchScalarGridSpec(
            num_scalar_prefetch=0,
            grid=(n_m, n_j, n_k),
            in_specs=in_specs,
            out_specs=pl.BlockSpec((tm, tn), lambda m, j, k: (m, j)),
            scratch_shapes=scratch_shapes,
        ),
        compiler_params=pltpu.CompilerParams(
            dimension_semantics=("parallel", "parallel", "arbitrary"),
            vmem_limit_bytes=vmem_limit),
        cost_estimate=cost,
    )(*args)


# ----------------------------------------------------------------------------- #
# Parameter preparation + ResidualBlock forward (two fused kernels)
# ----------------------------------------------------------------------------- #
def prepare_params(raw, *, batchnorm=True, eps=1e-5, matmul_dtype=jnp.bfloat16):
    """Fold eval-mode BN stats into (scale, shift), stack [bias, scale, shift]
    into one (3, N) array per norm, cast linear weights to bf16 for the MXU."""
    def fold(np_):
        if batchnorm:
            s = np_["gamma"] * lax.rsqrt(np_["var"] + eps)
            t = np_["beta"] - np_["mean"] * s
        else:
            s, t = np_["gamma"], np_["beta"]
        return s, t

    s1, t1 = fold(raw["norm1"])
    s2, t2 = fold(raw["norm2"])
    return {
        "w1": raw["lin1"]["w"].astype(matmul_dtype),
        "w2": raw["lin2"]["w"].astype(matmul_dtype),
        "p1": jnp.stack([raw["lin1"]["b"], s1, t1]).astype(jnp.float32),
        "p2": jnp.stack([raw["lin2"]["b"], s2, t2]).astype(jnp.float32),
    }


def residual_block_fwd(raw_params, x, *, batchnorm=True, eps=1e-5):
    """out = x + norm2( lin2( relu( norm1( lin1(x) ) ) ) ) — two fused pallas_calls."""
    # TODO(synk): single-pallas_call fusion of both linears (keeping h in VMEM)
    # would also remove the bf16 h round trip when tm*N fits; kept as two calls.
    norm = "batchnorm" if batchnorm else "layernorm"
    prm = prepare_params(raw_params, batchnorm=batchnorm, eps=eps)
    # Intermediate h round-trips HBM in bf16; all norm/ReLU/residual math is f32.
    h = fused_linear_norm(x, prm["w1"], prm["p1"], norm=norm, apply_relu=True,
                          eps=eps, out_dtype=jnp.bfloat16)
    return fused_linear_norm(h, prm["w2"], prm["p2"], norm=norm, apply_relu=False,
                             residual=x, eps=eps, out_dtype=x.dtype)


# ----------------------------------------------------------------------------- #
# Deterministic parameter init (PyTorch nn.Linear-style uniform bounds)
# ----------------------------------------------------------------------------- #
def init_params(key, in_features, *, batchnorm=True):
    keys = iter(jax.random.split(key, 12))
    bound = 1.0 / math.sqrt(in_features)

    def lin():
        return {"w": jax.random.uniform(next(keys), (in_features, in_features),
                                        jnp.float32, -bound, bound),
                "b": jax.random.uniform(next(keys), (in_features,),
                                        jnp.float32, -bound, bound)}

    def nrm():
        p = {"gamma": 1.0 + 0.1 * jax.random.normal(next(keys), (in_features,), jnp.float32),
             "beta": 0.1 * jax.random.normal(next(keys), (in_features,), jnp.float32)}
        if batchnorm:
            p["mean"] = 0.1 * jax.random.normal(next(keys), (in_features,), jnp.float32)
            p["var"] = jax.random.uniform(next(keys), (in_features,), jnp.float32, 0.5, 1.5)
        return p

    return {"lin1": lin(), "norm1": nrm(), "lin2": lin(), "norm2": nrm()}


# ----------------------------------------------------------------------------- #
# Pure-JAX reference with the same numerics (bf16 MXU operands, f32 math)
# ----------------------------------------------------------------------------- #
def residual_block_ref(raw, x, *, batchnorm=True, eps=1e-5):
    bf = jnp.bfloat16

    def nrm(z, p):
        if batchnorm:
            return (z - p["mean"]) * lax.rsqrt(p["var"] + eps) * p["gamma"] + p["beta"]
        m = jnp.mean(z, axis=-1, keepdims=True)
        v = jnp.mean((z - m) ** 2, axis=-1, keepdims=True)
        return (z - m) * lax.rsqrt(v + eps) * p["gamma"] + p["beta"]

    z1 = jnp.dot(x.astype(bf), raw["lin1"]["w"].astype(bf),
                 preferred_element_type=jnp.float32) + raw["lin1"]["b"]
    h = jnp.maximum(nrm(z1, raw["norm1"]), 0.0).astype(bf)
    z2 = jnp.dot(h, raw["lin2"]["w"].astype(bf),
                 preferred_element_type=jnp.float32) + raw["lin2"]["b"]
    return x + nrm(z2, raw["norm2"])


# ----------------------------------------------------------------------------- #
if __name__ == "__main__":
    key = jax.random.PRNGKey(0)
    batch, in_features = 8, 256            # small stand-in shapes; lane/sublane aligned

    kp, kx = jax.random.split(key)
    x = jax.random.normal(kx, (batch, in_features), jnp.float32)

    for batchnorm in (True, False):         # cover both norm variants of the module
        params = init_params(kp, in_features, batchnorm=batchnorm)
        fwd = jax.jit(partial(residual_block_fwd, batchnorm=batchnorm))
        out = fwd(params, x)
        jax.block_until_ready(out)

        ref = residual_block_ref(params, x, batchnorm=batchnorm)
        assert out.shape == (batch, in_features)
        assert out.dtype == x.dtype
        assert bool(jnp.all(jnp.isfinite(out)))
        assert bool(jnp.allclose(out, ref, rtol=5e-3, atol=5e-3)), (
            f"mismatch (batchnorm={batchnorm}): "
            f"max abs err {float(jnp.max(jnp.abs(out - ref)))}")

    print("KERNEL_OK")
</pallas_src>

<mosaic_0001>
module attributes {stable_mosaic.version = 11 : i64} {
  func.func @kernel(%arg0: i32, %arg1: i32, %arg2: i32, %arg3: memref<8x256xf32, #tpu.memory_space<vmem>>, %arg4: memref<256x256xbf16, #tpu.memory_space<vmem>>, %arg5: memref<3x256xf32, #tpu.memory_space<vmem>>, %arg6: memref<8x256xbf16, #tpu.memory_space<vmem>>, %arg7: memref<8x256xf32, #tpu.memory_space<vmem>>) attributes {dimension_semantics = [#tpu.dimension_semantics<parallel>, #tpu.dimension_semantics<parallel>, #tpu.dimension_semantics<arbitrary>], iteration_bounds = array<i64: 1, 1, 1>, scalar_prefetch = 0 : i64, scratch_operands = 1 : i64, tpu.core_type = #tpu.core_type<tc>, window_params = [{transform_indices = @transform_0, window_bounds = array<i64: 8, 256>}, {transform_indices = @transform_1, window_bounds = array<i64: 256, 256>}, {transform_indices = @transform_2, window_bounds = array<i64: 3, 256>}, {transform_indices = @transform_3, window_bounds = array<i64: 8, 256>}]} {
    %c0_i32 = arith.constant 0 : i32
    %0 = arith.cmpi eq, %arg2, %c0_i32 : i32
    %1 = arith.extui %0 : i1 to i32
    %c0_i32_0 = arith.constant 0 : i32
    %2 = arith.cmpi ne, %1, %c0_i32_0 : i32
    scf.if %2 {
      %c0_10 = arith.constant 0 : index
      %c0_11 = arith.constant 0 : index
      %13 = vector.load %arg5[%c0_10, %c0_11] : memref<3x256xf32, #tpu.memory_space<vmem>>, vector<1x256xf32>
      %14 = vector.shape_cast %13 : vector<1x256xf32> to vector<1x256xf32>
      %15 = vector.broadcast %14 : vector<1x256xf32> to vector<8x256xf32>
      %c0_12 = arith.constant 0 : index
      %c0_13 = arith.constant 0 : index
      %16 = vector.load %arg7[%c0_12, %c0_13] : memref<8x256xf32, #tpu.memory_space<vmem>>, vector<8x256xf32>
      tpu.vector_store %arg7[%c0_12, %c0_13], %15 {strides = array<i32>} : memref<8x256xf32, #tpu.memory_space<vmem>>, vector<8x256xf32>,
    } else {
    }
    %c0 = arith.constant 0 : index
    %c0_1 = arith.constant 0 : index
    %3 = vector.load %arg3[%c0, %c0_1] : memref<8x256xf32, #tpu.memory_space<vmem>>, vector<8x256xf32>
    %c0_2 = arith.constant 0 : index
    %c0_3 = arith.constant 0 : index
    %4 = vector.load %arg7[%c0_2, %c0_3] : memref<8x256xf32, #tpu.memory_space<vmem>>, vector<8x256xf32>
    %5 = arith.truncf %3 : vector<8x256xf32> to vector<8x256xbf16>
    %c0_4 = arith.constant 0 : index
    %c0_5 = arith.constant 0 : index
    %6 = vector.load %arg4[%c0_4, %c0_5] : memref<256x256xbf16, #tpu.memory_space<vmem>>, vector<256x256xbf16>
    %cst = arith.constant dense<0.000000e+00> : vector<8x256xf32>
    %7 = tpu.matmul %5, %6, %cst {dimension_numbers = #tpu.dot_dimension_numbers<[1], [0], [0], [1], [0, 0, 1, 1], [], []>} : vector<8x256xbf16>, vector<256x256xbf16>, vector<8x256xf32> -> vector<8x256xf32>
    %8 = arith.addf %4, %7 : vector<8x256xf32>
    %c0_6 = arith.constant 0 : index
    %c0_7 = arith.constant 0 : index
    %9 = vector.load %arg7[%c0_6, %c0_7] : memref<8x256xf32, #tpu.memory_space<vmem>>, vector<8x256xf32>
    tpu.vector_store %arg7[%c0_6, %c0_7], %8 {strides = array<i32>} : memref<8x256xf32, #tpu.memory_space<vmem>>, vector<8x256xf32>,
    %c0_i32_8 = arith.constant 0 : i32
    %10 = arith.cmpi eq, %arg2, %c0_i32_8 : i32
    %11 = arith.extui %10 : i1 to i32
    %c0_i32_9 = arith.constant 0 : i32
    %12 = arith.cmpi ne, %11, %c0_i32_9 : i32
    scf.if %12 {
      %c0_10 = arith.constant 0 : index
      %c0_11 = arith.constant 0 : index
      %13 = vector.load %arg7[%c0_10, %c0_11] : memref<8x256xf32, #tpu.memory_space<vmem>>, vector<8x256xf32>
      %c1 = arith.constant 1 : index
      %c0_12 = arith.constant 0 : index
      %14 = vector.load %arg5[%c1, %c0_12] : memref<3x256xf32, #tpu.memory_space<vmem>>, vector<1x256xf32>
      %c2 = arith.constant 2 : index
      %c0_13 = arith.constant 0 : index
      %15 = vector.load %arg5[%c2, %c0_13] : memref<3x256xf32, #tpu.memory_space<vmem>>, vector<1x256xf32>
      %16 = vector.broadcast %14 : vector<1x256xf32> to vector<8x256xf32>
      %17 = arith.mulf %13, %16 : vector<8x256xf32>
      %18 = vector.broadcast %15 : vector<1x256xf32> to vector<8x256xf32>
      %19 = arith.addf %17, %18 : vector<8x256xf32>
      %cst_14 = arith.constant 0.000000e+00 : f32
      %20 = vector.broadcast %cst_14 : f32 to vector<8x256xf32>
      %21 = arith.maximumf %19, %20 : vector<8x256xf32>
      %22 = arith.truncf %21 : vector<8x256xf32> to vector<8x256xbf16>
      %c0_15 = arith.constant 0 : index
      %c0_16 = arith.constant 0 : index
      %23 = vector.load %arg6[%c0_15, %c0_16] : memref<8x256xbf16, #tpu.memory_space<vmem>>, vector<8x256xbf16>
      tpu.vector_store %arg6[%c0_15, %c0_16], %22 {strides = array<i32>} : memref<8x256xbf16, #tpu.memory_space<vmem>>, vector<8x256xbf16>,
    } else {
    }
    return
  }
  func.func @transform_0(%arg0: i32, %arg1: i32, %arg2: i32) -> (i32, i32) {
    %c0_i32 = arith.constant 0 : i32
    %c0_i32_0 = arith.constant 0 : i32
    return %arg0, %c0_i32 : i32, i32
  }
  func.func @transform_1(%arg0: i32, %arg1: i32, %arg2: i32) -> (i32, i32) {
    %c0_i32 = arith.constant 0 : i32
    return %arg2, %arg1 : i32, i32
  }
  func.func @transform_2(%arg0: i32, %arg1: i32, %arg2: i32) -> (i32, i32) {
    %c0_i32 = arith.constant 0 : i32
    %c0_i32_0 = arith.constant 0 : i32
    return %c0_i32, %arg1 : i32, i32
  }
  func.func @transform_3(%arg0: i32, %arg1: i32, %arg2: i32) -> (i32, i32) {
    %c0_i32 = arith.constant 0 : i32
    return %arg0, %arg1 : i32, i32
  }
}

module attributes {stable_mosaic.version = 11 : i64} {
  func.func @kernel(%arg0: i32, %arg1: i32, %arg2: i32, %arg3: memref<8x256xbf16, #tpu.memory_space<vmem>>, %arg4: memref<256x256xbf16, #tpu.memory_space<vmem>>, %arg5: memref<3x256xf32, #tpu.memory_space<vmem>>, %arg6: memref<8x256xf32, #tpu.memory_space<vmem>>, %arg7: memref<8x256xf32, #tpu.memory_space<vmem>>) attributes {dimension_semantics = [#tpu.dimension_semantics<parallel>, #tpu.dimension_semantics<parallel>, #tpu.dimension_semantics<arbitrary>], iteration_bounds = array<i64: 1, 1, 1>, scalar_prefetch = 0 : i64, scratch_operands = 0 : i64, tpu.core_type = #tpu.core_type<tc>, window_params = [{transform_indices = @transform_0, window_bounds = array<i64: 8, 256>}, {transform_indices = @transform_1, window_bounds = array<i64: 256, 256>}, {transform_indices = @transform_2, window_bounds = array<i64: 3, 256>}, {transform_indices = @transform_3, window_bounds = array<i64: 8, 256>}, {transform_indices = @transform_4, window_bounds = array<i64: 8, 256>}]} {
    %c0_i32 = arith.constant 0 : i32
    %0 = arith.cmpi eq, %arg2, %c0_i32 : i32
    %1 = arith.extui %0 : i1 to i32
    %c0_i32_0 = arith.constant 0 : i32
    %2 = arith.cmpi ne, %1, %c0_i32_0 : i32
    scf.if %2 {
      %c0_10 = arith.constant 0 : index
      %c0_11 = arith.constant 0 : index
      %12 = vector.load %arg5[%c0_10, %c0_11] : memref<3x256xf32, #tpu.memory_space<vmem>>, vector<1x256xf32>
      %13 = vector.shape_cast %12 : vector<1x256xf32> to vector<1x256xf32>
      %14 = vector.broadcast %13 : vector<1x256xf32> to vector<8x256xf32>
      %c0_12 = arith.constant 0 : index
      %c0_13 = arith.constant 0 : index
      %15 = vector.load %arg7[%c0_12, %c0_13] : memref<8x256xf32, #tpu.memory_space<vmem>>, vector<8x256xf32>
      tpu.vector_store %arg7[%c0_12, %c0_13], %14 {strides = array<i32>} : memref<8x256xf32, #tpu.memory_space<vmem>>, vector<8x256xf32>,
    } else {
    }
    %c0 = arith.constant 0 : index
    %c0_1 = arith.constant 0 : index
    %3 = vector.load %arg3[%c0, %c0_1] : memref<8x256xbf16, #tpu.memory_space<vmem>>, vector<8x256xbf16>
    %c0_2 = arith.constant 0 : index
    %c0_3 = arith.constant 0 : index
    %4 = vector.load %arg7[%c0_2, %c0_3] : memref<8x256xf32, #tpu.memory_space<vmem>>, vector<8x256xf32>
    %c0_4 = arith.constant 0 : index
    %c0_5 = arith.constant 0 : index
    %5 = vector.load %arg4[%c0_4, %c0_5] : memref<256x256xbf16, #tpu.memory_space<vmem>>, vector<256x256xbf16>
    %cst = arith.constant dense<0.000000e+00> : vector<8x256xf32>
    %6 = tpu.matmul %3, %5, %cst {dimension_numbers = #tpu.dot_dimension_numbers<[1], [0], [0], [1], [0, 0, 1, 1], [], []>} : vector<8x256xbf16>, vector<256x256xbf16>, vector<8x256xf32> -> vector<8x256xf32>
    %7 = arith.addf %4, %6 : vector<8x256xf32>
    %c0_6 = arith.constant 0 : index
    %c0_7 = arith.constant 0 : index
    %8 = vector.load %arg7[%c0_6, %c0_7] : memref<8x256xf32, #tpu.memory_space<vmem>>, vector<8x256xf32>
    tpu.vector_store %arg7[%c0_6, %c0_7], %7 {strides = array<i32>} : memref<8x256xf32, #tpu.memory_space<vmem>>, vector<8x256xf32>,
    %c0_i32_8 = arith.constant 0 : i32
    %9 = arith.cmpi eq, %arg2, %c0_i32_8 : i32
    %10 = arith.extui %9 : i1 to i32
    %c0_i32_9 = arith.constant 0 : i32
    %11 = arith.cmpi ne, %10, %c0_i32_9 : i32
    scf.if %11 {
      %c0_10 = arith.constant 0 : index
      %c0_11 = arith.constant 0 : index
      %12 = vector.load %arg7[%c0_10, %c0_11] : memref<8x256xf32, #tpu.memory_space<vmem>>, vector<8x256xf32>
      %c1 = arith.constant 1 : index
      %c0_12 = arith.constant 0 : index
      %13 = vector.load %arg5[%c1, %c0_12] : memref<3x256xf32, #tpu.memory_space<vmem>>, vector<1x256xf32>
      %c2 = arith.constant 2 : index
      %c0_13 = arith.constant 0 : index
      %14 = vector.load %arg5[%c2, %c0_13] : memref<3x256xf32, #tpu.memory_space<vmem>>, vector<1x256xf32>
      %15 = vector.broadcast %13 : vector<1x256xf32> to vector<8x256xf32>
      %16 = arith.mulf %12, %15 : vector<8x256xf32>
      %17 = vector.broadcast %14 : vector<1x256xf32> to vector<8x256xf32>
      %18 = arith.addf %16, %17 : vector<8x256xf32>
      %c0_14 = arith.constant 0 : index
      %c0_15 = arith.constant 0 : index
      %19 = vector.load %arg6[%c0_14, %c0_15] : memref<8x256xf32, #tpu.memory_space<vmem>>, vector<8x256xf32>
      %20 = arith.addf %18, %19 : vector<8x256xf32>
      %c0_16 = arith.constant 0 : index
      %c0_17 = arith.constant 0 : index
      %21 = vector.load %arg7[%c0_16, %c0_17] : memref<8x256xf32, #tpu.memory_space<vmem>>, vector<8x256xf32>
      tpu.vector_store %arg7[%c0_16, %c0_17], %20 {strides = array<i32>} : memref<8x256xf32, #tpu.memory_space<vmem>>, vector<8x256xf32>,
    } else {
    }
    return
  }
  func.func @transform_0(%arg0: i32, %arg1: i32, %arg2: i32) -> (i32, i32) {
    %c0_i32 = arith.constant 0 : i32
    %c0_i32_0 = arith.constant 0 : i32
    return %arg0, %c0_i32 : i32, i32
  }
  func.func @transform_1(%arg0: i32, %arg1: i32, %arg2: i32) -> (i32, i32) {
    %c0_i32 = arith.constant 0 : i32
    return %arg2, %arg1 : i32, i32
  }
  func.func @transform_2(%arg0: i32, %arg1: i32, %arg2: i32) -> (i32, i32) {
    %c0_i32 = arith.constant 0 : i32
    %c0_i32_0 = arith.constant 0 : i32
    return %c0_i32, %arg1 : i32, i32
  }
  func.func @transform_3(%arg0: i32, %arg1: i32, %arg2: i32) -> (i32, i32) {
    %c0_i32 = arith.constant 0 : i32
    return %arg0, %arg1 : i32, i32
  }
  func.func @transform_4(%arg0: i32, %arg1: i32, %arg2: i32) -> (i32, i32) {
    %c0_i32 = arith.constant 0 : i32
    return %arg0, %arg1 : i32, i32
  }
}

</mosaic_0001>

<bundles_post_ra>
// kernel: residual_block_fwd.2
= control target key start
LH: loop header
LB: loop body
LE: loop exit
PB: predicated region body
PF: predicated region fallthrough
CT: control target
= control target key end

     0   :  { %v20_v36 = vlaneseq  ;;  %s543_s1 = inlined_call_operand.vmem [shape: bf16[256,256], index: 1, kind: input, shape index: {}]   ;;  %s544_s0 = inlined_call_operand.vmem [shape: f32[8,256], index: 0, kind: input, shape index: {}]   ;;  %s545_s2 = inlined_call_operand.vmem [shape: f32[3,256], index: 2, kind: input, shape index: {}]   ;;  %s546_s3 = inlined_call_operand.vmem [shape: bf16[8,256], index: 3, kind: output, shape index: {}]  }
   0x1   :  { %v361_v0 = vld [vmem:[%s543_s1 + $0x4] ss:$8 sps:$4 sm:$0xff]   ;;  %v363_v1 = vld [vmem:[%s543_s1] ss:$8 sps:$4 sm:$0xff]   ;;  %v364_v2 = vld [vmem:[%s543_s1 + $0x14] ss:$8 sps:$4 sm:$0xff]  }
   0x2   :  { %230 = vmatprep.subr.bf16.mxu0 %v361_v0  ;;  %v366_v3 = vld [vmem:[%s543_s1 + $0x10] ss:$8 sps:$4 sm:$0xff]   ;;  %v367_v4 = vld [vmem:[%s543_s1 + $0x24] ss:$8 sps:$4 sm:$0xff]   ;;  %v369_v5 = vld [vmem:[%s543_s1 + $0x20] ss:$8 sps:$4 sm:$0xff]  }
   0x3   :  { %231 = vmatpush1.bf16.msra.mxu0 %v363_v1  ;;  %v370_v6 = vld [vmem:[%s543_s1 + $0x34] ss:$8 sps:$4 sm:$0xff]   ;;  %v372_v7 = vld [vmem:[%s543_s1 + $0x30] ss:$8 sps:$4 sm:$0xff]   ;;  %v373_v8 = vld [vmem:[%s543_s1 + $0x44] ss:$8 sps:$4 sm:$0xff]  }
   0x4   :  { %232 = vmatprep.subr.bf16.mxu0 %v364_v2  ;;  %v375_v9 = vld [vmem:[%s543_s1 + $0x40] ss:$8 sps:$4 sm:$0xff]   ;;  %v376_v10 = vld [vmem:[%s543_s1 + $0x54] ss:$8 sps:$4 sm:$0xff]   ;;  %v378_v11 = vld [vmem:[%s543_s1 + $0x50] ss:$8 sps:$4 sm:$0xff]  }
   0x5   :  { %v379_v12 = vld [vmem:[%s543_s1 + $0x64] ss:$8 sps:$4 sm:$0xff]   ;;  %v381_v15 = vld [vmem:[%s543_s1 + $0x60] ss:$8 sps:$4 sm:$0xff]   ;;  %v382_v16 = vld [vmem:[%s543_s1 + $0x74] ss:$8 sps:$4 sm:$0xff]  }
   0x6   :  { %v33_v13 = vld [vmem:[%s544_s0 + $0x8] sm:$0xff]  ;;  %v384_v17 = vld [vmem:[%s543_s1 + $0x70] ss:$8 sps:$4 sm:$0xff]   ;;  %v388_v20 = vld [vmem:[%s543_s1 + $0x94] ss:$8 sps:$4 sm:$0xff]   ;;  %v21_v37 = vshrl.u32 %v20_v36, 7 }
   0x7   :  { %233 = vmatpush1.bf16.msra.mxu0 %v366_v3  ;;  %v37_v14 = vpack.c.bf16 %v33_v13, %v33_v13  ;;  %v385_v18 = vld [vmem:[%s543_s1 + $0x84] ss:$8 sps:$4 sm:$0xff]   ;;  %v387_v19 = vld [vmem:[%s543_s1 + $0x80] ss:$8 sps:$4 sm:$0xff]   ;;  %v390_v21 = vld [vmem:[%s543_s1 + $0x90] ss:$8 sps:$4 sm:$0xff]  }
   0x8   :  { %234 = vmatprep.subr.bf16.mxu0 %v367_v4  ;;  %v391_v22 = vld [vmem:[%s543_s1 + $0xa4] ss:$8 sps:$4 sm:$0xff]   ;;  %v393_v23 = vld [vmem:[%s543_s1 + $0xa0] ss:$8 sps:$4 sm:$0xff]   ;;  %v394_v24 = vld [vmem:[%s543_s1 + $0xb4] ss:$8 sps:$4 sm:$0xff]  }
   0x9   :  { %262 = vmatprep.mubr.bf16.mxu0 %v37_v14  ;;  %v396_v25 = vld [vmem:[%s543_s1 + $0xb0] ss:$8 sps:$4 sm:$0xff]   ;;  %v397_v26 = vld [vmem:[%s543_s1 + $0xc4] ss:$8 sps:$4 sm:$0xff]   ;;  %v399_v27 = vld [vmem:[%s543_s1 + $0xc0] ss:$8 sps:$4 sm:$0xff]  }
   0xa   :  { %v400_v28 = vld [vmem:[%s543_s1 + $0xd4] ss:$8 sps:$4 sm:$0xff]   ;;  %v402_v29 = vld [vmem:[%s543_s1 + $0xd0] ss:$8 sps:$4 sm:$0xff]   ;;  %v403_v30 = vld [vmem:[%s543_s1 + $0xe4] ss:$8 sps:$4 sm:$0xff]  }
   0xb   :  { %235 = vmatpush1.bf16.msra.mxu0 %v369_v5  ;;  %v405_v31 = vld [vmem:[%s543_s1 + $0xe0] ss:$8 sps:$4 sm:$0xff]   ;;  %v406_v32 = vld [vmem:[%s543_s1 + $0xf4] ss:$8 sps:$4 sm:$0xff]   ;;  %v408_v33 = vld [vmem:[%s543_s1 + $0xf0] ss:$8 sps:$4 sm:$0xff]  }
   0xc   :  { %236 = vmatprep.subr.bf16.mxu0 %v370_v6  ;;  %v32_v34 = vld [vmem:[%s544_s0] sm:$0xff]  ;;  %v22_v38 = vsub.s32 0, %v21_v37  ;;  %v26_v40 = vsub.s32 1, %v21_v37 }
   0xd   :  { %v36_v35 = vpack.c.bf16 %v32_v34, %v32_v34  ;;  %v18_v39 = vld [vmem:[%s545_s2] ss:$4 sm:$0x3]  ;;  %v357_v41 = vld [vmem:[%s545_s2 + $0x1] ss:$4 sm:$0x3] }
   0xe   :  { %v23_v42 = vrot.slane %v18_v39, %v22_v38  ;;  %v358_v43 = vld [vmem:[%s545_s2 + $0x2] ss:$4 sm:$0x3]  ;;  %v27_v44 = vrot.slane %v18_v39, %v26_v40  ;;  %v288_v45 = vrot.slane %v357_v41, %v22_v38  ;;  %v292_v47 = vrot.slane %v357_v41, %v26_v40 }
   0xf   :  { %237 = vmatpush1.bf16.msra.mxu0 %v372_v7  ;;  %v301_v49 = vrot.slane %v358_v43, %v22_v38  ;;  %v305_v52 = vrot.slane %v358_v43, %v26_v40 }
  0x10   :  { %238 = vmatprep.subr.bf16.mxu0 %v373_v8 }
  0x13   :  { %239 = vmatpush1.bf16.msra.mxu0 %v375_v9 }
  0x14   :  { %240 = vmatprep.subr.bf16.mxu0 %v376_v10 }
  0x17   :  { %241 = vmatpush1.bf16.msra.mxu0 %v378_v11 }
  0x18   :  { %242 = vmatprep.subr.bf16.mxu0 %v379_v12 }
  0x1b   :  { %243 = vmatpush1.bf16.msra.mxu0 %v381_v15 }
  0x1c   :  { %244 = vmatprep.subr.bf16.mxu0 %v382_v16 }
  0x1f   :  { %245 = vmatpush1.bf16.msra.mxu0 %v384_v17 }
  0x20   :  { %246 = vmatprep.subr.bf16.mxu0 %v385_v18 }
  0x23   :  { %247 = vmatpush1.bf16.msra.mxu0 %v387_v19 }
  0x24   :  { %248 = vmatprep.subr.bf16.mxu0 %v388_v20 }
  0x27   :  { %249 = vmatpush1.bf16.msra.mxu0 %v390_v21 }
  0x28   :  { %250 = vmatprep.subr.bf16.mxu0 %v391_v22 }
  0x2b   :  { %251 = vmatpush1.bf16.msra.mxu0 %v393_v23 }
  0x2c   :  { %252 = vmatprep.subr.bf16.mxu0 %v394_v24 }
  0x2f   :  { %253 = vmatpush1.bf16.msra.mxu0 %v396_v25 }
  0x30   :  { %254 = vmatprep.subr.bf16.mxu0 %v397_v26 }
  0x33   :  { %255 = vmatpush1.bf16.msra.mxu0 %v399_v27 }
  0x34   :  { %256 = vmatprep.subr.bf16.mxu0 %v400_v28 }
  0x37   :  { %257 = vmatpush1.bf16.msra.mxu0 %v402_v29 }
  0x38   :  { %258 = vmatprep.subr.bf16.mxu0 %v403_v30 }
  0x3b   :  { %259 = vmatpush1.bf16.msra.mxu0 %v405_v31 }
  0x3c   :  { %260 = vmatprep.subr.bf16.mxu0 %v406_v32 }
  0x3f   :  { %261 = vmatpush1.bf16.msra.mxu0 %v408_v33 }
  0x42   :  { %263 = vmatmul.mubr.bf16.vlgmr.msra.gmra.mrb[0].mxu0 %v36_v35 }
 0x115   :  { %v264_v46 = vpop.f32.mrb[0].mxu0 }
 0x116   :  { %v271_v48 = vadd.f32 %v264_v46, %v23_v42  ;;  %v266_v50 = vpop.f32.mrb[1].mxu0 }
 0x117   :  { %v272_v51 = vadd.f32 %v266_v50, %v27_v44  ;;  %v268_v53 = vpop.f32.mrb[2].mxu0 }
 0x118   :  { %v295_v54 = vmul.f32 %v288_v45, %v271_v48  ;;  %v269_v55 = vpop.f32.mrb[3].mxu0 }
 0x119   :  { %v296_v56 = vmul.f32 %v292_v47, %v272_v51 }
 0x11a   :  { %v308_v57 = vadd.f32 %v301_v49, %v295_v54 }
 0x11b   :  { %v309_v58 = vadd.f32 %v305_v52, %v296_v56 }
 0x11c   :  { %v310_v59 = vmax.f32 %v308_v57, 0.0 }
 0x11d   :  { %v311_v60 = vmax.f32 %v309_v58, 0.0 }
 0x11f   :  { %v360_v61 = vpack.c.bf16 %v311_v60, %v310_v59 }
 0x121   :  { %320 = vst [vmem:[%s546_s3] sm:$0xff] %v360_v61 }

// kernel: residual_block_fwd.3
= control target key start
LH: loop header
LB: loop body
LE: loop exit
PB: predicated region body
PF: predicated region fallthrough
CT: control target
= control target key end

     0   :  { %s601_s0 = inlined_call_operand.vmem [shape: bf16[8,256], index: 0, kind: input, shape index: {}]   ;;  %s602_s1 = inlined_call_operand.vmem [shape: bf16[256,256], index: 1, kind: input, shape index: {}]   ;;  %s603_s2 = inlined_call_operand.vmem [shape: f32[3,256], index: 2, kind: input, shape index: {}]   ;;  %s604_s3 = inlined_call_operand.vmem [shape: f32[8,256], index: 3, kind: input, shape index: {}]   ;;  %s605_s4 = inlined_call_operand.hbm [shape: f32[8,256], index: 4, kind: output, shape index: {}]  }
   0x1   :  { %v375_v0 = vld [vmem:[%s602_s1 + $0x4] ss:$8 sps:$4 sm:$0xff]   ;;  %v377_v1 = vld [vmem:[%s602_s1] ss:$8 sps:$4 sm:$0xff]   ;;  %v378_v2 = vld [vmem:[%s602_s1 + $0x14] ss:$8 sps:$4 sm:$0xff]  }
   0x2   :  { %238 = vmatprep.subr.bf16.mxu0 %v375_v0  ;;  %v380_v3 = vld [vmem:[%s602_s1 + $0x10] ss:$8 sps:$4 sm:$0xff]   ;;  %v381_v4 = vld [vmem:[%s602_s1 + $0x24] ss:$8 sps:$4 sm:$0xff]   ;;  %v383_v5 = vld [vmem:[%s602_s1 + $0x20] ss:$8 sps:$4 sm:$0xff]  }
   0x3   :  { %239 = vmatpush1.bf16.msra.mxu0 %v377_v1  ;;  %v384_v6 = vld [vmem:[%s602_s1 + $0x34] ss:$8 sps:$4 sm:$0xff]   ;;  %v386_v7 = vld [vmem:[%s602_s1 + $0x30] ss:$8 sps:$4 sm:$0xff]   ;;  %v387_v8 = vld [vmem:[%s602_s1 + $0x44] ss:$8 sps:$4 sm:$0xff]  }
   0x4   :  { %240 = vmatprep.subr.bf16.mxu0 %v378_v2  ;;  %v389_v9 = vld [vmem:[%s602_s1 + $0x40] ss:$8 sps:$4 sm:$0xff]   ;;  %v390_v10 = vld [vmem:[%s602_s1 + $0x54] ss:$8 sps:$4 sm:$0xff]   ;;  %v392_v11 = vld [vmem:[%s602_s1 + $0x50] ss:$8 sps:$4 sm:$0xff]  }
   0x5   :  { %v393_v12 = vld [vmem:[%s602_s1 + $0x64] ss:$8 sps:$4 sm:$0xff]  }
   0x6   :  { %v36_v13 = vld [vmem:[%s601_s0] sm:$0xff] }
   0x7   :  { %241 = vmatpush1.bf16.msra.mxu0 %v380_v3  ;;  %v339_v14 = vcombine.high %v36_v13, %v36_v13 }
   0x8   :  { %242 = vmatprep.subr.bf16.mxu0 %v381_v4 }
   0xb   :  { %243 = vmatpush1.bf16.msra.mxu0 %v383_v5 }
   0xc   :  { %244 = vmatprep.subr.bf16.mxu0 %v384_v6 }
   0xf   :  { %245 = vmatpush1.bf16.msra.mxu0 %v386_v7 }
  0x10   :  { %246 = vmatprep.subr.bf16.mxu0 %v387_v8 }
  0x13   :  { %247 = vmatpush1.bf16.msra.mxu0 %v389_v9 }
  0x14   :  { %248 = vmatprep.subr.bf16.mxu0 %v390_v10 }
  0x15   :  { %9 = vsyncpa [#allocation3], 0  ;;  %v395_v15 = vld [vmem:[%s602_s1 + $0x60] ss:$8 sps:$4 sm:$0xff]   ;;  %v396_v16 = vld [vmem:[%s602_s1 + $0x74] ss:$8 sps:$4 sm:$0xff]   ;;  %270 = vmatprep.mubr.bf16.mxu0 %v339_v14  ;;  %v338_v34 = vcombine.low %v36_v13, %v36_v13  ;;  %v24_v35 = vlaneseq }
  0x16   :  { %v398_v17 = vld [vmem:[%s602_s1 + $0x70] ss:$8 sps:$4 sm:$0xff]   ;;  %v399_v18 = vld [vmem:[%s602_s1 + $0x84] ss:$8 sps:$4 sm:$0xff]   ;;  %v401_v19 = vld [vmem:[%s602_s1 + $0x80] ss:$8 sps:$4 sm:$0xff]  }
  0x17   :  { %249 = vmatpush1.bf16.msra.mxu0 %v392_v11  ;;  %v402_v20 = vld [vmem:[%s602_s1 + $0x94] ss:$8 sps:$4 sm:$0xff]   ;;  %v404_v21 = vld [vmem:[%s602_s1 + $0x90] ss:$8 sps:$4 sm:$0xff]   ;;  %v405_v22 = vld [vmem:[%s602_s1 + $0xa4] ss:$8 sps:$4 sm:$0xff]  }
  0x18   :  { %250 = vmatprep.subr.bf16.mxu0 %v393_v12  ;;  %v407_v23 = vld [vmem:[%s602_s1 + $0xa0] ss:$8 sps:$4 sm:$0xff]   ;;  %v408_v24 = vld [vmem:[%s602_s1 + $0xb4] ss:$8 sps:$4 sm:$0xff]   ;;  %v410_v25 = vld [vmem:[%s602_s1 + $0xb0] ss:$8 sps:$4 sm:$0xff]  }
  0x19   :  { %v411_v26 = vld [vmem:[%s602_s1 + $0xc4] ss:$8 sps:$4 sm:$0xff]   ;;  %v413_v27 = vld [vmem:[%s602_s1 + $0xc0] ss:$8 sps:$4 sm:$0xff]   ;;  %v414_v28 = vld [vmem:[%s602_s1 + $0xd4] ss:$8 sps:$4 sm:$0xff]  }
  0x1a   :  { %v416_v29 = vld [vmem:[%s602_s1 + $0xd0] ss:$8 sps:$4 sm:$0xff]   ;;  %v417_v30 = vld [vmem:[%s602_s1 + $0xe4] ss:$8 sps:$4 sm:$0xff]   ;;  %v419_v31 = vld [vmem:[%s602_s1 + $0xe0] ss:$8 sps:$4 sm:$0xff]  }
  0x1b   :  { %251 = vmatpush1.bf16.msra.mxu0 %v395_v15  ;;  %v420_v32 = vld [vmem:[%s602_s1 + $0xf4] ss:$8 sps:$4 sm:$0xff]   ;;  %v422_v33 = vld [vmem:[%s602_s1 + $0xf0] ss:$8 sps:$4 sm:$0xff]   ;;  %v25_v36 = vshrl.u32 %v24_v35, 7  ;;  %v318_v56 = vld [vmem:[%s604_s3] sm:$0xff] }
  0x1c   :  { %252 = vmatprep.subr.bf16.mxu0 %v396_v16  ;;  %v22_v38 = vld [vmem:[%s603_s2] ss:$4 sm:$0x3]  ;;  %v372_v40 = vld [vmem:[%s603_s2 + $0x1] ss:$4 sm:$0x3] }
  0x1d   :  { %v26_v37 = vsub.s32 0, %v25_v36  ;;  %v30_v39 = vsub.s32 1, %v25_v36  ;;  %v373_v43 = vld [vmem:[%s603_s2 + $0x2] ss:$4 sm:$0x3]  ;;  %v319_v58 = vld [vmem:[%s604_s3 + $0x8] sm:$0xff] }
  0x1e   :  { %s449_s2 = smov [#allocation2]  }
  0x1f   :  { %253 = vmatpush1.bf16.msra.mxu0 %v398_v17  ;;  %v27_v41 = vrot.slane %v22_v38, %v26_v37  ;;  %v31_v42 = vrot.slane %v22_v38, %v30_v39  ;;  %v296_v44 = vrot.slane %v372_v40, %v26_v37  ;;  %v300_v46 = vrot.slane %v372_v40, %v30_v39  ;;  %s330_s10 = sshll.u32 %s449_s2, 4  ;;  %s331_s10 = int_to_ptr.vmem [resolvable:$true] %s330_s10 }
  0x20   :  { %254 = vmatprep.subr.bf16.mxu0 %v399_v18  ;;  %v309_v49 = vrot.slane %v373_v43, %v26_v37  ;;  %v313_v52 = vrot.slane %v373_v43, %v30_v39  ;;  %s425_s11 = scalar_lea.vmem %s331_s10, 256  ;;  %p430_p1 = scmp.lt.s32.totalorder %s331_s10, %s331_s10 }
  0x21   :  { %p426_p0 = scmp.ne.s32.totalorder %s331_s10, %s425_s11  ;;  %p431_p2 = scmp.lt.s32.totalorder %s425_s11, %s425_s11 }
  0x23   :  { %255 = vmatpush1.bf16.msra.mxu0 %v401_v19  ;;  %p432_p3 = por %p431_p2, %p430_p1 }
  0x24   :  { %256 = vmatprep.subr.bf16.mxu0 %v402_v20 }
  0x25   :  { %p433_p4 = pnand %p432_p3, %p426_p0 }
  0x27   :  { %257 = vmatpush1.bf16.msra.mxu0 %v404_v21 }
  0x28   :  { %258 = vmatprep.subr.bf16.mxu0 %v405_v22 }
  0x2b   :  { %259 = vmatpush1.bf16.msra.mxu0 %v407_v23 }
  0x2c   :  { %260 = vmatprep.subr.bf16.mxu0 %v408_v24 }
  0x2f   :  { %261 = vmatpush1.bf16.msra.mxu0 %v410_v25 }
  0x30   :  { %262 = vmatprep.subr.bf16.mxu0 %v411_v26 }
  0x33   :  { %263 = vmatpush1.bf16.msra.mxu0 %v413_v27 }
  0x34   :  { %264 = vmatprep.subr.bf16.mxu0 %v414_v28 }
  0x37   :  { %265 = vmatpush1.bf16.msra.mxu0 %v416_v29 }
  0x38   :  { %266 = vmatprep.subr.bf16.mxu0 %v417_v30 }
  0x3b   :  { %267 = vmatpush1.bf16.msra.mxu0 %v419_v31 }
  0x3c   :  { %268 = vmatprep.subr.bf16.mxu0 %v420_v32 }
  0x3f   :  { %269 = vmatpush1.bf16.msra.mxu0 %v422_v33 }
  0x42   :  { %271 = vmatmul.mubr.bf16.vlgmr.msra.gmra.mrb[0].mxu0 %v338_v34 }
 0x115   :  { %v272_v45 = vpop.f32.mrb[0].mxu0 }
 0x116   :  { %v279_v47 = vadd.f32 %v272_v45, %v27_v41  ;;  %v274_v48 = vpop.f32.mrb[1].mxu0 }
 0x117   :  { %v280_v50 = vadd.f32 %v274_v48, %v31_v42  ;;  %v276_v51 = vpop.f32.mrb[2].mxu0 }
 0x118   :  { %v277_v53 = vpop.f32.mrb[3].mxu0  ;;  %v303_v54 = vmul.f32 %v296_v44, %v279_v47 }
 0x119   :  { %v304_v55 = vmul.f32 %v300_v46, %v280_v50 }
 0x11a   :  { %v316_v57 = vadd.f32 %v309_v49, %v303_v54 }
 0x11b   :  { %v317_v59 = vadd.f32 %v313_v52, %v304_v55 }
 0x11c   :  { %v320_v60 = vadd.f32 %v318_v56, %v316_v57 }
 0x11d   :  { %v321_v61 = vadd.f32 %v319_v58, %v317_v59 }
 0x11e   :  { %322 = vst [vmem:[#allocation2] sm:$0xff] %v320_v60 }
 0x11f   :  { %323 = vst [vmem:[#allocation2 + $0x8] sm:$0xff] %v321_v61 }
 0x120   :  { %436 = shalt.err (!%p433_p4)
}
 0x121   :  { %s437_s14 = scalar_lea.hbm %s605_s4, 256 }
 0x122   :  { %p438_p5 = scmp.ne.s32.totalorder %s605_s4, %s437_s14  ;;  %p441_p6 = scmp.lt.u32.totalorder %s437_s14, %s605_s4 }
 0x124   :  { %p443_p7 = pnand %p441_p6, %p438_p5 }
 0x126   :  { %446 = shalt.err (!%p443_p7)
}
 0x127   :  { %333 = dma.vmem_to_hbm [thread:$0]  %s331_s10, 256, %s605_s4, [#allocation3]  }
 0x128   :  { %447 = dma.done.wait [#allocation3], 256  }
 0x129   :  { %448 = vsyncadd [#allocation3], 4294967040 }
 0x12a   :  { %337 = vsyncpa [#allocation3], 1 }

</bundles_post_ra>
